<compile_context>
chip_gen: v6e
topology: v6e:2x2x1
jax: 0.10.0
libtpu: 0.0.40
codegen_flags: <defaults>
</compile_context>

<pallas_src>
import jax
import jax.numpy as jnp
from jax.experimental import pallas as pl
from jax.experimental.pallas import tpu as pltpu


def _fused_sage_kernel(a_ref, x_ref, wt_ref, b_ref, o_ref):
    # a_ref:  (N, N)     row-normalized adjacency, bf16, resident all layers
    # x_ref:  (N, D)     zero-padded input features, bf16
    # wt_ref: (L, D, D)  padded per-layer W^T stack, bf16, resident
    # b_ref:  (L, 1, D)  padded per-layer bias stack, f32
    # o_ref:  (N, D)     padded f32 output slab (written exactly once)
    n_layers = wt_ref.shape[0]
    a = a_ref[...]                       # bf16 (N, N)
    h = x_ref[...]                       # bf16 (N, D) for layer 0
    out = None
    for l in range(n_layers):            # static unroll: 6 matmuls back-to-back
        # Reassociated form: A @ (h @ W^T) + b  ==  (A @ h) @ W^T + b
        # bf16 matmul inputs, f32 MXU accumulate; epilogue (bias, ReLU) in f32.
        z = jnp.dot(h.astype(jnp.bfloat16), wt_ref[l],
                    preferred_element_type=jnp.float32)
        out = jnp.dot(a, z.astype(jnp.bfloat16),
                      preferred_element_type=jnp.float32) + b_ref[l]
        if l != n_layers - 1:
            h = jnp.maximum(out, 0.0)     # ReLU (f32); Dropout = eval identity
    o_ref[...] = out.astype(o_ref.dtype)


def _round_up(v, m):
    return ((v + m - 1) // m) * m


def build_sage_operands(a_norm, x, params):
    """One-time glue (hoisted out of the hot path): zero-pad every feature dim
    to a lane-dense multiple of 128, stack per-layer W^T / bias, and pre-cast
    the matmul operands to bf16.  Zero padding of W^T columns and bias keeps
    the padded lanes exactly zero through every layer."""
    n_layers = len(params)
    dims = [x.shape[1]] + [w.shape[0] for (w, _) in params]
    D = _round_up(max(dims + [128]), 128)
    N = a_norm.shape[0]

    x_pad = jnp.zeros((N, D), jnp.float32).at[:, : dims[0]].set(
        x.astype(jnp.float32))
    wt_stack = jnp.zeros((n_layers, D, D), jnp.float32)
    b_stack = jnp.zeros((n_layers, 1, D), jnp.float32)
    for l, (w, b) in enumerate(params):
        dout, din = w.shape
        wt_stack = wt_stack.at[l, :din, :dout].set(w.T.astype(jnp.float32))
        b_stack = b_stack.at[l, 0, :dout].set(b.astype(jnp.float32))

    return (a_norm.astype(jnp.bfloat16),      # A: bf16 (halves DMA, MXU input)
            x_pad.astype(jnp.bfloat16),        # X: bf16 (first matmul input)
            wt_stack.astype(jnp.bfloat16),     # W^T stack: bf16
            b_stack,                           # bias: f32 (f32 epilogue)
            dims[-1])


@jax.jit
def sage_forward_padded(a_bf, x_bf, wt_stack, b_stack):
    """Hot path: a single pallas_call, everything resident in VMEM."""
    N = a_bf.shape[0]
    n_layers, D, _ = wt_stack.shape
    return pl.pallas_call(
        _fused_sage_kernel,
        out_shape=jax.ShapeDtypeStruct((N, D), jnp.float32),
        grid=(1,),
        in_specs=[
            pl.BlockSpec((N, N), lambda i: (0, 0)),              # A_norm
            pl.BlockSpec((N, D), lambda i: (0, 0)),              # padded X
            pl.BlockSpec((n_layers, D, D), lambda i: (0, 0, 0)),  # W^T stack
            pl.BlockSpec((n_layers, 1, D), lambda i: (0, 0, 0)),  # bias stack
        ],
        out_specs=pl.BlockSpec((N, D), lambda i: (0, 0)),
        compiler_params=pltpu.CompilerParams(
            dimension_semantics=("arbitrary",)),
    )(a_bf, x_bf, wt_stack, b_stack)


def sage_forward(a_norm, x, params):
    """Fused 3-layer SAGE('gcn') forward (eval-mode dropout = identity)."""
    a_bf, x_bf, wt_stack, b_stack, out_width = build_sage_operands(
        a_norm, x, params)
    out_pad = sage_forward_padded(a_bf, x_bf, wt_stack, b_stack)
    return out_pad[:, :out_width]


def _xavier_uniform(key, shape):
    fan_out, fan_in = shape
    limit = jnp.sqrt(6.0 / (fan_in + fan_out))
    return jax.random.uniform(key, shape, jnp.float32, -limit, limit)


def build_normalized_adjacency(key, n_nodes, p_edge=0.1):
    # Random directed graph; A_in[i, j] = 1 if there is an edge j -> i.
    adj = (jax.random.uniform(key, (n_nodes, n_nodes)) < p_edge).astype(jnp.float32)
    adj = adj * (1.0 - jnp.eye(n_nodes, dtype=jnp.float32))  # no self loops in A
    in_deg = jnp.sum(adj, axis=1, keepdims=True)             # (N, 1)
    a_norm = (adj + jnp.eye(n_nodes, dtype=jnp.float32)) / (in_deg + 1.0)
    return a_norm


if __name__ == "__main__":
    N = 128          # number of nodes
    in_size = 64
    hid_size = 64
    out_size = 32

    root = jax.random.PRNGKey(0)
    k_adj, k_x, k_w1, k_w2, k_w3 = jax.random.split(root, 5)

    a_norm = build_normalized_adjacency(k_adj, N)
    x = jax.random.normal(k_x, (N, in_size), jnp.float32)

    # DGL SAGEConv: fc_neigh weight (out, in) Xavier-init, bias zeros.
    params = [
        (_xavier_uniform(k_w1, (hid_size, in_size)), jnp.zeros((hid_size,), jnp.float32)),
        (_xavier_uniform(k_w2, (hid_size, hid_size)), jnp.zeros((hid_size,), jnp.float32)),
        (_xavier_uniform(k_w3, (out_size, hid_size)), jnp.zeros((out_size,), jnp.float32)),
    ]

    # --- glue hoisted out of the hot path: build padded/stacked operands once.
    a_bf, x_bf, wt_stack, b_stack, out_width = jax.block_until_ready(
        build_sage_operands(a_norm, x, params))

    # --- hot path: single fused pallas_call.
    out_pad = sage_forward_padded(a_bf, x_bf, wt_stack, b_stack)
    out = jax.block_until_ready(out_pad)[:, :out_width]

    # Pure-JAX f32 reference (canonical association, unpadded). The kernel uses
    # bf16 matmul inputs with f32 accumulate, so tolerance is relaxed
    # accordingly (expected deviation ~1e-3; margin kept comfortable).
    h_ref = x
    for l, (w, b) in enumerate(params):
        h_ref = (a_norm @ h_ref) @ w.T + b
        if l != len(params) - 1:
            h_ref = jnp.maximum(h_ref, 0.0)

    assert out.shape == (N, out_size)
    assert jnp.allclose(out, h_ref, atol=2e-2, rtol=2e-2), (
        float(jnp.max(jnp.abs(out - h_ref))))

    print("KERNEL_OK")
</pallas_src>

<mosaic_0001>
module attributes {stable_mosaic.version = 11 : i64} {
  func.func @_fused_sage_kernel(%arg0: i32, %arg1: memref<128x128xbf16, #tpu.memory_space<vmem>>, %arg2: memref<128x128xbf16, #tpu.memory_space<vmem>>, %arg3: memref<3x128x128xbf16, #tpu.memory_space<vmem>>, %arg4: memref<3x1x128xf32, #tpu.memory_space<vmem>>, %arg5: memref<128x128xf32, #tpu.memory_space<vmem>>) attributes {dimension_semantics = [#tpu.dimension_semantics<arbitrary>], iteration_bounds = array<i64: 1>, scalar_prefetch = 0 : i64, scratch_operands = 0 : i64, tpu.core_type = #tpu.core_type<tc>, window_params = [{pipeline_mode = #tpu.pipeline_mode<synchronous>, transform_indices = @transform_0, window_bounds = array<i64: 128, 128>}, {pipeline_mode = #tpu.pipeline_mode<synchronous>, transform_indices = @transform_1, window_bounds = array<i64: 128, 128>}, {pipeline_mode = #tpu.pipeline_mode<synchronous>, transform_indices = @transform_2, window_bounds = array<i64: 3, 128, 128>}, {pipeline_mode = #tpu.pipeline_mode<synchronous>, transform_indices = @transform_3, window_bounds = array<i64: 3, 1, 128>}, {pipeline_mode = #tpu.pipeline_mode<synchronous>, transform_indices = @transform_4, window_bounds = array<i64: 128, 128>}]} {
    %c0 = arith.constant 0 : index
    %c0_0 = arith.constant 0 : index
    %0 = vector.load %arg1[%c0, %c0_0] : memref<128x128xbf16, #tpu.memory_space<vmem>>, vector<128x128xbf16>
    %c0_1 = arith.constant 0 : index
    %c0_2 = arith.constant 0 : index
    %1 = vector.load %arg2[%c0_1, %c0_2] : memref<128x128xbf16, #tpu.memory_space<vmem>>, vector<128x128xbf16>
    %c0_3 = arith.constant 0 : index
    %c0_4 = arith.constant 0 : index
    %c0_5 = arith.constant 0 : index
    %2 = vector.load %arg3[%c0_3, %c0_4, %c0_5] : memref<3x128x128xbf16, #tpu.memory_space<vmem>>, vector<1x128x128xbf16>
    %3 = vector.shape_cast %2 : vector<1x128x128xbf16> to vector<128x128xbf16>
    %cst = arith.constant dense<0.000000e+00> : vector<128x128xf32>
    %4 = tpu.matmul %1, %3, %cst {dimension_numbers = #tpu.dot_dimension_numbers<[1], [0], [0], [1], [0, 0, 1, 1], [], []>} : vector<128x128xbf16>, vector<128x128xbf16>, vector<128x128xf32> -> vector<128x128xf32>
    %5 = arith.truncf %4 : vector<128x128xf32> to vector<128x128xbf16>
    %cst_6 = arith.constant dense<0.000000e+00> : vector<128x128xf32>
    %6 = tpu.matmul %0, %5, %cst_6 {dimension_numbers = #tpu.dot_dimension_numbers<[1], [0], [0], [1], [0, 0, 1, 1], [], []>} : vector<128x128xbf16>, vector<128x128xbf16>, vector<128x128xf32> -> vector<128x128xf32>
    %c0_7 = arith.constant 0 : index
    %c0_8 = arith.constant 0 : index
    %c0_9 = arith.constant 0 : index
    %7 = vector.load %arg4[%c0_7, %c0_8, %c0_9] : memref<3x1x128xf32, #tpu.memory_space<vmem>>, vector<1x1x128xf32>
    %8 = vector.shape_cast %7 : vector<1x1x128xf32> to vector<1x128xf32>
    %9 = vector.broadcast %8 : vector<1x128xf32> to vector<128x128xf32>
    %10 = arith.addf %6, %9 : vector<128x128xf32>
    %cst_10 = arith.constant 0.000000e+00 : f32
    %11 = vector.broadcast %cst_10 : f32 to vector<128x128xf32>
    %12 = arith.maximumf %10, %11 : vector<128x128xf32>
    %13 = arith.truncf %12 : vector<128x128xf32> to vector<128x128xbf16>
    %c1 = arith.constant 1 : index
    %c0_11 = arith.constant 0 : index
    %c0_12 = arith.constant 0 : index
    %14 = vector.load %arg3[%c1, %c0_11, %c0_12] : memref<3x128x128xbf16, #tpu.memory_space<vmem>>, vector<1x128x128xbf16>
    %15 = vector.shape_cast %14 : vector<1x128x128xbf16> to vector<128x128xbf16>
    %cst_13 = arith.constant dense<0.000000e+00> : vector<128x128xf32>
    %16 = tpu.matmul %13, %15, %cst_13 {dimension_numbers = #tpu.dot_dimension_numbers<[1], [0], [0], [1], [0, 0, 1, 1], [], []>} : vector<128x128xbf16>, vector<128x128xbf16>, vector<128x128xf32> -> vector<128x128xf32>
    %17 = arith.truncf %16 : vector<128x128xf32> to vector<128x128xbf16>
    %cst_14 = arith.constant dense<0.000000e+00> : vector<128x128xf32>
    %18 = tpu.matmul %0, %17, %cst_14 {dimension_numbers = #tpu.dot_dimension_numbers<[1], [0], [0], [1], [0, 0, 1, 1], [], []>} : vector<128x128xbf16>, vector<128x128xbf16>, vector<128x128xf32> -> vector<128x128xf32>
    %c1_15 = arith.constant 1 : index
    %c0_16 = arith.constant 0 : index
    %c0_17 = arith.constant 0 : index
    %19 = vector.load %arg4[%c1_15, %c0_16, %c0_17] : memref<3x1x128xf32, #tpu.memory_space<vmem>>, vector<1x1x128xf32>
    %20 = vector.shape_cast %19 : vector<1x1x128xf32> to vector<1x128xf32>
    %21 = vector.broadcast %20 : vector<1x128xf32> to vector<128x128xf32>
    %22 = arith.addf %18, %21 : vector<128x128xf32>
    %cst_18 = arith.constant 0.000000e+00 : f32
    %23 = vector.broadcast %cst_18 : f32 to vector<128x128xf32>
    %24 = arith.maximumf %22, %23 : vector<128x128xf32>
    %25 = arith.truncf %24 : vector<128x128xf32> to vector<128x128xbf16>
    %c2 = arith.constant 2 : index
    %c0_19 = arith.constant 0 : index
    %c0_20 = arith.constant 0 : index
    %26 = vector.load %arg3[%c2, %c0_19, %c0_20] : memref<3x128x128xbf16, #tpu.memory_space<vmem>>, vector<1x128x128xbf16>
    %27 = vector.shape_cast %26 : vector<1x128x128xbf16> to vector<128x128xbf16>
    %cst_21 = arith.constant dense<0.000000e+00> : vector<128x128xf32>
    %28 = tpu.matmul %25, %27, %cst_21 {dimension_numbers = #tpu.dot_dimension_numbers<[1], [0], [0], [1], [0, 0, 1, 1], [], []>} : vector<128x128xbf16>, vector<128x128xbf16>, vector<128x128xf32> -> vector<128x128xf32>
    %29 = arith.truncf %28 : vector<128x128xf32> to vector<128x128xbf16>
    %cst_22 = arith.constant dense<0.000000e+00> : vector<128x128xf32>
    %30 = tpu.matmul %0, %29, %cst_22 {dimension_numbers = #tpu.dot_dimension_numbers<[1], [0], [0], [1], [0, 0, 1, 1], [], []>} : vector<128x128xbf16>, vector<128x128xbf16>, vector<128x128xf32> -> vector<128x128xf32>
    %c2_23 = arith.constant 2 : index
    %c0_24 = arith.constant 0 : index
    %c0_25 = arith.constant 0 : index
    %31 = vector.load %arg4[%c2_23, %c0_24, %c0_25] : memref<3x1x128xf32, #tpu.memory_space<vmem>>, vector<1x1x128xf32>
    %32 = vector.shape_cast %31 : vector<1x1x128xf32> to vector<1x128xf32>
    %33 = vector.broadcast %32 : vector<1x128xf32> to vector<128x128xf32>
    %34 = arith.addf %30, %33 : vector<128x128xf32>
    %c0_26 = arith.constant 0 : index
    %c0_27 = arith.constant 0 : index
    %35 = vector.load %arg5[%c0_26, %c0_27] : memref<128x128xf32, #tpu.memory_space<vmem>>, vector<128x128xf32>
    tpu.vector_store %arg5[%c0_26, %c0_27], %34 {strides = array<i32>} : memref<128x128xf32, #tpu.memory_space<vmem>>, vector<128x128xf32>,
    return
  }
  func.func @transform_0(%arg0: i32) -> (i32, i32) {
    %c0_i32 = arith.constant 0 : i32
    %c0_i32_0 = arith.constant 0 : i32
    %c0_i32_1 = arith.constant 0 : i32
    return %c0_i32, %c0_i32_0 : i32, i32
  }
  func.func @transform_1(%arg0: i32) -> (i32, i32) {
    %c0_i32 = arith.constant 0 : i32
    %c0_i32_0 = arith.constant 0 : i32
    %c0_i32_1 = arith.constant 0 : i32
    return %c0_i32, %c0_i32_0 : i32, i32
  }
  func.func @transform_2(%arg0: i32) -> (i32, i32, i32) {
    %c0_i32 = arith.constant 0 : i32
    %c0_i32_0 = arith.constant 0 : i32
    %c0_i32_1 = arith.constant 0 : i32
    %c0_i32_2 = arith.constant 0 : i32
    return %c0_i32, %c0_i32_0, %c0_i32_1 : i32, i32, i32
  }
  func.func @transform_3(%arg0: i32) -> (i32, i32, i32) {
    %c0_i32 = arith.constant 0 : i32
    %c0_i32_0 = arith.constant 0 : i32
    %c0_i32_1 = arith.constant 0 : i32
    %c0_i32_2 = arith.constant 0 : i32
    return %c0_i32, %c0_i32_0, %c0_i32_1 : i32, i32, i32
  }
  func.func @transform_4(%arg0: i32) -> (i32, i32) {
    %c0_i32 = arith.constant 0 : i32
    %c0_i32_0 = arith.constant 0 : i32
    %c0_i32_1 = arith.constant 0 : i32
    return %c0_i32, %c0_i32_0 : i32, i32
  }
}

</mosaic_0001>

<bundles_post_ra>
// kernel: sage_forward_padded.1
= control target key start
LH: loop header
LB: loop body
LE: loop exit
PB: predicated region body
PF: predicated region fallthrough
CT: control target
= control target key end

     0   :  { %9 = vsyncpa [#allocation3], 0  ;;  %s1654_s0 = inlined_call_operand.hbm [shape: bf16[128,128], index: 0, kind: input, shape index: {}]   ;;  %s1655_s1 = inlined_call_operand.hbm [shape: bf16[128,128], index: 1, kind: input, shape index: {}]   ;;  %s1656_s2 = inlined_call_operand.hbm [shape: bf16[3,128,128], index: 2, kind: input, shape index: {}]   ;;  %s1657_s3 = inlined_call_operand.vmem [shape: f32[3,1,128], index: 3, kind: input, shape index: {}]   ;;  %s1658_s4 = inlined_call_operand.hbm [shape: f32[128,128], index: 4, kind: output, shape index: {}]  }
   0x1   :  { %10 = vsyncpa [#allocation6], 0 }
   0x2   :  { %11 = vsyncpa [#allocation4], 0  ;;  %s1560_s15 = smov [#allocation5]   ;;  %s1561_s17 = smov [#allocation2]  }
   0x3   :  { %s29_s16 = sshll.u32 %s1560_s15, 4  ;;  %s17_s18 = sshll.u32 %s1561_s17, 4  ;;  %s30_s16 = int_to_ptr.vmem [resolvable:$true] %s29_s16  ;;  %s18_s18 = int_to_ptr.vmem [resolvable:$true] %s17_s18 }
   0x4   :  { %s1482_s19 = scalar_lea.vmem %s30_s16, 1024  ;;  %p1487_p1 = scmp.lt.s32.totalorder %s30_s16, %s30_s16 }
   0x5   :  { %p1483_p0 = scmp.ne.s32.totalorder %s30_s16, %s1482_s19  ;;  %p1488_p2 = scmp.lt.s32.totalorder %s1482_s19, %s1482_s19 }
   0x7   :  { %p1489_p3 = por %p1488_p2, %p1487_p1 }
   0x9   :  { %p1490_p4 = pnand %p1489_p3, %p1483_p0 }
   0xb   :  { %1493 = shalt.err (!%p1490_p4)
}
   0xc   :  { %s1562_s20 = smov 64   ;;  %s1563_s21 = smov 4  }
   0xd   :  { %35 = dma.hbm_to_vmem [thread:$0]  %s1655_s1, 1024, %s30_s16, [#allocation6], %s1562_s20, %s1562_s20, %s1563_s21  }
   0xe   :  { %s1502_s24 = scalar_lea.vmem %s18_s18, 1024  ;;  %p1507_p6 = scmp.lt.s32.totalorder %s18_s18, %s18_s18 }
   0xf   :  { %p1503_p5 = scmp.ne.s32.totalorder %s18_s18, %s1502_s24  ;;  %p1508_p7 = scmp.lt.s32.totalorder %s1502_s24, %s1502_s24 }
  0x11   :  { %p1509_p8 = por %p1508_p7, %p1507_p6 }
  0x13   :  { %p1510_p9 = pnand %p1509_p8, %p1503_p5 }
  0x15   :  { %1513 = shalt.err (!%p1510_p9)
}
  0x16   :  { %23 = dma.hbm_to_vmem [thread:$0]  %s1654_s0, 1024, %s18_s18, [#allocation3], %s1562_s20, %s1562_s20, %s1563_s21  }
  0x17   :  { %s1564_s27 = smov [#allocation7]  }
  0x18   :  { %s41_s28 = sshll.u32 %s1564_s27, 4  ;;  %s42_s28 = int_to_ptr.vmem [resolvable:$true] %s41_s28 }
  0x19   :  { %s1522_s29 = scalar_lea.vmem %s42_s28, 3072  ;;  %p1527_p11 = scmp.lt.s32.totalorder %s42_s28, %s42_s28 }
  0x1a   :  { %p1523_p10 = scmp.ne.s32.totalorder %s42_s28, %s1522_s29  ;;  %p1528_p12 = scmp.lt.s32.totalorder %s1522_s29, %s1522_s29 }
  0x1c   :  { %p1529_p13 = por %p1528_p12, %p1527_p11 }
  0x1e   :  { %p1530_p0 = pnand %p1529_p13, %p1523_p10 }
  0x20   :  { %1533 = shalt.err (!%p1530_p0)
}
  0x21   :  { %47 = dma.hbm_to_vmem [thread:$0]  %s1656_s2, 3072, %s42_s28, [#allocation6], %s1562_s20, %s1562_s20, %s1563_s21  }
  0x22   :  { %1554 = dma.done.wait [#allocation3], 1024  }
  0x23   :  { %1555 = vsyncadd [#allocation3], 4294966272 }
  0x24   :  { %1556 = dma.done.wait [#allocation6], 4096  }
  0x25   :  { %1557 = vsyncadd [#allocation6], 4294963200  ;;  %v1434_v0 = vld [vmem:[#allocation7 + $0x38] sm:$0xff]   ;;  %v1435_v1 = vld [vmem:[#allocation7 + $0x30] sm:$0xff]  }
  0x26   :  { %1234 = vmatprep.subr.bf16.mxu0 %v1434_v0  ;;  %v1436_v2 = vld [vmem:[#allocation7 + $0x28] sm:$0xff]   ;;  %v1437_v3 = vld [vmem:[#allocation7 + $0x20] sm:$0xff]   ;;  %v1438_v5 = vld [vmem:[#allocation7 + $0x18] sm:$0xff]  }
  0x27   :  { %1235 = vmatpush3.bf16.msra.mxu0 %v1434_v0  ;;  %v1442_v4 = vld [vmem:[#allocation5] sm:$0xff]   ;;  %v1439_v6 = vld [vmem:[#allocation7 + $0x10] sm:$0xff]   ;;  %v1440_v7 = vld [vmem:[#allocation7 + $0x8] sm:$0xff]  }
  0x28   :  { %1236 = vmatprep.subr.bf16.mxu0 %v1435_v1  ;;  %1250 = vmatprep.mubr.bf16.mxu0 %v1442_v4  ;;  %v1441_v8 = vld [vmem:[#allocation7] sm:$0xff]   ;;  %v1443_v9 = vld [vmem:[#allocation5 + $0x8] sm:$0xff]   ;;  %v1444_v10 = vld [vmem:[#allocation5 + $0x10] sm:$0xff]  }
  0x29   :  { %v1445_v11 = vld [vmem:[#allocation5 + $0x18] sm:$0xff]   ;;  %v1446_v12 = vld [vmem:[#allocation5 + $0x20] sm:$0xff]   ;;  %v1447_v13 = vld [vmem:[#allocation5 + $0x28] sm:$0xff]  }
  0x2a   :  { %v1448_v14 = vld [vmem:[#allocation5 + $0x30] sm:$0xff]   ;;  %v1449_v15 = vld [vmem:[#allocation5 + $0x38] sm:$0xff]   ;;  %v1602_v16 = vld [vmem:[#allocation2] sm:$0xff]  }
  0x2b   :  { %1237 = vmatpush3.bf16.msra.mxu0 %v1435_v1  ;;  %1282 = vmatprep.mubr.bf16.mxu1 %v1602_v16  ;;  %v1458_v17 = vld [vmem:[#allocation7 + $0x78] sm:$0xff]   ;;  %v1459_v18 = vld [vmem:[#allocation7 + $0x70] sm:$0xff]   ;;  %v1460_v19 = vld [vmem:[#allocation7 + $0x68] sm:$0xff]  }
  0x2c   :  { %1238 = vmatprep.subr.bf16.mxu0 %v1436_v2  ;;  %v1461_v20 = vld [vmem:[#allocation7 + $0x60] sm:$0xff]   ;;  %v1462_v21 = vld [vmem:[#allocation7 + $0x58] sm:$0xff]   ;;  %v1605_v46 = vld [vmem:[#allocation2 + $0x8] sm:$0xff]  }
  0x2d   :  { %v1607_v47 = vld [vmem:[#allocation2 + $0x10] sm:$0xff]   ;;  %v1611_v48 = vld [vmem:[#allocation2 + $0x18] sm:$0xff]   ;;  %v1613_v49 = vld [vmem:[#allocation2 + $0x20] sm:$0xff]  }
  0x2e   :  { %v1617_v50 = vld [vmem:[#allocation2 + $0x28] sm:$0xff]   ;;  %v1619_v51 = vld [vmem:[#allocation2 + $0x30] sm:$0xff]   ;;  %v1623_v52 = vld [vmem:[#allocation2 + $0x38] sm:$0xff]  }
  0x2f   :  { %1239 = vmatpush3.bf16.msra.mxu0 %v1436_v2  ;;  %v1463_v53 = vld [vmem:[#allocation7 + $0x50] sm:$0xff]   ;;  %v1464_v54 = vld [vmem:[#allocation7 + $0x48] sm:$0xff]   ;;  %v1465_v55 = vld [vmem:[#allocation7 + $0x40] sm:$0xff]  }
  0x30   :  { %1240 = vmatprep.subr.bf16.mxu0 %v1437_v3  ;;  %v1109_v58 = vld [vmem:[%s1657_s3] ss:$0 sm:$0xff] }
  0x33   :  { %1241 = vmatpush3.bf16.msra.mxu0 %v1437_v3 }
  0x34   :  { %1242 = vmatprep.subr.bf16.mxu0 %v1438_v5 }
  0x37   :  { %1243 = vmatpush3.bf16.msra.mxu0 %v1438_v5 }
  0x38   :  { %1244 = vmatprep.subr.bf16.mxu0 %v1439_v6 }
  0x3b   :  { %1245 = vmatpush3.bf16.msra.mxu0 %v1439_v6 }
  0x3c   :  { %1246 = vmatprep.subr.bf16.mxu0 %v1440_v7 }
  0x3f   :  { %1247 = vmatpush3.bf16.msra.mxu0 %v1440_v7 }
  0x40   :  { %1248 = vmatprep.subr.bf16.mxu0 %v1441_v8 }
  0x43   :  { %1249 = vmatpush3.bf16.msra.mxu0 %v1441_v8 }
  0x44   :  { %1298 = vmatprep.subr.bf16.mxu0 %v1458_v17 }
  0x46   :  { %1251 = vmatmul.mubr.bf16.vlgmr.msra.gmra.mxu0 %v1443_v9 }
  0x47   :  { %1254 = vmatprep.mubr.bf16.mxu0 %v1444_v10  ;;  %1299 = vmatpush3.bf16.msra.mxu0 %v1458_v17 }
  0x48   :  { %1300 = vmatprep.subr.bf16.mxu0 %v1459_v18 }
  0x4b   :  { %1301 = vmatpush3.bf16.msra.mxu0 %v1459_v18 }
  0x4c   :  { %1302 = vmatprep.subr.bf16.mxu0 %v1460_v19 }
  0x4e   :  { %1255 = vmatmul.mubr.bf16.gmra.mxu0 %v1445_v11 }
  0x4f   :  { %1258 = vmatprep.mubr.bf16.mxu0 %v1446_v12  ;;  %1303 = vmatpush3.bf16.msra.mxu0 %v1460_v19 }
  0x50   :  { %1304 = vmatprep.subr.bf16.mxu0 %v1461_v20 }
  0x53   :  { %1305 = vmatpush3.bf16.msra.mxu0 %v1461_v20 }
  0x54   :  { %1306 = vmatprep.subr.bf16.mxu0 %v1462_v21 }
  0x56   :  { %1259 = vmatmul.mubr.bf16.gmra.mxu0 %v1447_v13 }
  0x57   :  { %1262 = vmatprep.mubr.bf16.mxu0 %v1448_v14  ;;  %1307 = vmatpush3.bf16.msra.mxu0 %v1462_v21 }
  0x58   :  { %1308 = vmatprep.subr.bf16.mxu0 %v1463_v53 }
  0x5b   :  { %1309 = vmatpush3.bf16.msra.mxu0 %v1463_v53 }
  0x5c   :  { %1310 = vmatprep.subr.bf16.mxu0 %v1464_v54 }
  0x5e   :  { %1263 = vmatmul.mubr.bf16.gmra.mxu0 %v1449_v15 }
  0x5f   :  { %1311 = vmatpush3.bf16.msra.mxu0 %v1464_v54 }
  0x60   :  { %1312 = vmatprep.subr.bf16.mxu0 %v1465_v55 }
  0x63   :  { %1313 = vmatpush3.bf16.msra.mxu0 %v1465_v55 }
 0x106   :  { %v1252_v22 = vpop.f32.mrf.mxu0 }
 0x108   :  { %v238_v23 = vpop.f32.mrf.mxu0 }
 0x10a   :  { %v1253_v24 = vpop.f32.mrf.mxu0 }
 0x10b   :  { %v302_v44 = vpack.c.bf16 %v1253_v24, %v1252_v22 }
 0x10c   :  { %v241_v25 = vpop.f32.mrf.mxu0 }
 0x10d   :  { %v301_v45 = vpack.c.bf16 %v241_v25, %v238_v23 }
 0x10e   :  { %v1256_v26 = vpop.f32.mrf.mxu0 }
 0x110   :  { %v254_v27 = vpop.f32.mrf.mxu0 }
 0x112   :  { %v1257_v28 = vpop.f32.mrf.mxu0 }
 0x113   :  { %v304_v42 = vpack.c.bf16 %v1257_v28, %v1256_v26 }
 0x114   :  { %v257_v29 = vpop.f32.mrf.mxu0 }
 0x115   :  { %v303_v43 = vpack.c.bf16 %v257_v29, %v254_v27 }
 0x116   :  { %v1260_v30 = vpop.f32.mrf.mxu0 }
 0x118   :  { %v270_v31 = vpop.f32.mrf.mxu0 }
 0x11a   :  { %v1261_v32 = vpop.f32.mrf.mxu0 }
 0x11b   :  { %v306_v40 = vpack.c.bf16 %v1261_v32, %v1260_v30 }
 0x11c   :  { %v273_v33 = vpop.f32.mrf.mxu0 }
 0x11d   :  { %v305_v41 = vpack.c.bf16 %v273_v33, %v270_v31 }
 0x11e   :  { %v1264_v34 = vpop.f32.mrf.mxu0 }
 0x120   :  { %v286_v35 = vpop.f32.mrf.mxu0 }
 0x122   :  { %v1265_v36 = vpop.f32.mrf.mxu0 }
 0x123   :  { %v308_v37 = vpack.c.bf16 %v1265_v36, %v1264_v34 }
 0x124   :  { %v289_v38 = vpop.f32.mrf.mxu0 }
 0x125   :  { %v307_v39 = vpack.c.bf16 %v289_v38, %v286_v35  ;;  %1266 = vmatprep.subr.bf16.mxu1 %v308_v37 }
 0x126   :  { %1267 = vmatpush3.bf16.msra.mxu1 %v308_v37 }
 0x127   :  { %1268 = vmatprep.subr.bf16.mxu1 %v307_v39 }
 0x12a   :  { %1269 = vmatpush3.bf16.msra.mxu1 %v307_v39 }
 0x12b   :  { %1270 = vmatprep.subr.bf16.mxu1 %v306_v40 }
 0x12e   :  { %1271 = vmatpush3.bf16.msra.mxu1 %v306_v40 }
 0x12f   :  { %1272 = vmatprep.subr.bf16.mxu1 %v305_v41 }
 0x132   :  { %1273 = vmatpush3.bf16.msra.mxu1 %v305_v41 }
 0x133   :  { %1274 = vmatprep.subr.bf16.mxu1 %v304_v42 }
 0x136   :  { %1275 = vmatpush3.bf16.msra.mxu1 %v304_v42 }
 0x137   :  { %1276 = vmatprep.subr.bf16.mxu1 %v303_v43 }
 0x13a   :  { %1277 = vmatpush3.bf16.msra.mxu1 %v303_v43 }
 0x13b   :  { %1278 = vmatprep.subr.bf16.mxu1 %v302_v44 }
 0x13e   :  { %1279 = vmatpush3.bf16.msra.mxu1 %v302_v44 }
 0x13f   :  { %1280 = vmatprep.subr.bf16.mxu1 %v301_v45 }
 0x142   :  { %1281 = vmatpush3.bf16.msra.mxu1 %v301_v45 }
 0x145   :  { %1283 = vmatmul.mubr.bf16.vlgmr.msra.gmra.mxu1 %v1605_v46 }
 0x146   :  { %1286 = vmatprep.mubr.bf16.mxu1 %v1607_v47 }
 0x14d   :  { %1287 = vmatmul.mubr.bf16.gmra.mxu1 %v1611_v48 }
 0x14e   :  { %1290 = vmatprep.mubr.bf16.mxu1 %v1613_v49 }
 0x155   :  { %1291 = vmatmul.mubr.bf16.gmra.mxu1 %v1617_v50 }
 0x156   :  { %1294 = vmatprep.mubr.bf16.mxu1 %v1619_v51 }
 0x15d   :  { %1295 = vmatmul.mubr.bf16.gmra.mxu1 %v1623_v52 }
 0x15e   :  { %1346 = vmatprep.mubr.bf16.mxu1 %v1602_v16 }
 0x205   :  { %v1284_v56 = vpop.f32.mrf.mxu1 }
 0x206   :  { %v407_v62 = vadd.f32 %v1284_v56, %v1109_v58 }
 0x207   :  { %v398_v57 = vpop.f32.mrf.mxu1 }
 0x208   :  { %v399_v60 = vadd.f32 %v1109_v58, %v398_v57  ;;  %v463_v5 = vmax.f32 %v407_v62, 0.0  ;;  %v1466_v57 = vld [vmem:[#allocation7 + $0xb8] sm:$0xff]  }
 0x209   :  { %v1285_v59 = vpop.f32.mrf.mxu1  ;;  %1362 = vmatprep.subr.bf16.mxu0 %v1466_v57 }
 0x20a   :  { %v410_v61 = vadd.f32 %v1285_v59, %v1109_v58  ;;  %v461_v3 = vmax.f32 %v399_v60, 0.0  ;;  %v1467_v59 = vld [vmem:[#allocation7 + $0xb0] sm:$0xff]   ;;  %v1468_v60 = vld [vmem:[#allocation7 + $0xa8] sm:$0xff]  }
 0x20b   :  { %v401_v63 = vpop.f32.mrf.mxu1 }
 0x20c   :  { %v402_v0 = vadd.f32 %v1109_v58, %v401_v63  ;;  %v464_v1 = vmax.f32 %v410_v61, 0.0  ;;  %v1469_v61 = vld [vmem:[#allocation7 + $0xa0] sm:$0xff]  }
 0x20d   :  { %v1288_v2 = vpop.f32.mrf.mxu1 }
 0x20e   :  { %v462_v4 = vmax.f32 %v402_v0, 0.0  ;;  %v478_v8 = vpack.c.bf16 %v464_v1, %v463_v5  ;;  %v423_v12 = vadd.f32 %v1288_v2, %v1109_v58 }
 0x20f   :  { %v414_v6 = vpop.f32.mrf.mxu1 }
 0x210   :  { %v477_v7 = vpack.c.bf16 %v462_v4, %v461_v3  ;;  %v415_v10 = vadd.f32 %v1109_v58, %v414_v6  ;;  %v467_v20 = vmax.f32 %v423_v12, 0.0 }
 0x211   :  { %v1289_v9 = vpop.f32.mrf.mxu1 }
 0x212   :  { %v426_v11 = vadd.f32 %v1289_v9, %v1109_v58  ;;  %1314 = vmatprep.mubr.bf16.mxu0 %v477_v7  ;;  %v465_v18 = vmax.f32 %v415_v10, 0.0 }
 0x213   :  { %v417_v13 = vpop.f32.mrf.mxu1  ;;  %1315 = vmatmul.mubr.bf16.vlgmr.msra.gmra.mxu0 %v478_v8 }
 0x214   :  { %v418_v14 = vadd.f32 %v1109_v58, %v417_v13  ;;  %v468_v15 = vmax.f32 %v426_v11, 0.0  ;;  %1363 = vmatpush3.bf16.msra.mxu0 %v1466_v57 }
 0x215   :  { %v1292_v17 = vpop.f32.mrf.mxu1  ;;  %1364 = vmatprep.subr.bf16.mxu0 %v1467_v59 }
 0x216   :  { %v466_v19 = vmax.f32 %v418_v14, 0.0  ;;  %v480_v23 = vpack.c.bf16 %v468_v15, %v467_v20  ;;  %v439_v27 = vadd.f32 %v1292_v17, %v1109_v58 }
 0x217   :  { %v430_v21 = vpop.f32.mrf.mxu1 }
 0x218   :  { %v479_v22 = vpack.c.bf16 %v466_v19, %v465_v18  ;;  %v431_v25 = vadd.f32 %v1109_v58, %v430_v21  ;;  %v471_v34 = vmax.f32 %v439_v27, 0.0  ;;  %1365 = vmatpush3.bf16.msra.mxu0 %v1467_v59 }
 0x219   :  { %v1293_v24 = vpop.f32.mrf.mxu1  ;;  %1366 = vmatprep.subr.bf16.mxu0 %v1468_v60 }
 0x21a   :  { %v442_v26 = vadd.f32 %v1293_v24, %v1109_v58  ;;  %1318 = vmatprep.mubr.bf16.mxu0 %v479_v22  ;;  %v469_v32 = vmax.f32 %v431_v25, 0.0  ;;  %v1472_v24 = vld [vmem:[#allocation7 + $0x88] sm:$0xff]   ;;  %v1473_v25 = vld [vmem:[#allocation7 + $0x80] sm:$0xff]  }
 0x21b   :  { %v433_v28 = vpop.f32.mrf.mxu1  ;;  %1319 = vmatmul.mubr.bf16.gmra.mxu0 %v480_v23  ;;  %v1471_v23 = vld [vmem:[#allocation7 + $0x90] sm:$0xff]  }
 0x21c   :  { %v434_v29 = vadd.f32 %v1109_v58, %v433_v28  ;;  %v472_v30 = vmax.f32 %v442_v26, 0.0  ;;  %1367 = vmatpush3.bf16.msra.mxu0 %v1468_v60  ;;  %v1127_v28 = vld [vmem:[%s1657_s3 + $0x1] ss:$0 sm:$0xff] }
 0x21d   :  { %v1296_v31 = vpop.f32.mrf.mxu1  ;;  %1368 = vmatprep.subr.bf16.mxu0 %v1469_v61 }
 0x21e   :  { %v470_v33 = vmax.f32 %v434_v29, 0.0  ;;  %v482_v37 = vpack.c.bf16 %v472_v30, %v471_v34  ;;  %v455_v41 = vadd.f32 %v1296_v31, %v1109_v58 }
 0x21f   :  { %v446_v35 = vpop.f32.mrf.mxu1 }
 0x220   :  { %v481_v36 = vpack.c.bf16 %v470_v33, %v469_v32  ;;  %v447_v39 = vadd.f32 %v1109_v58, %v446_v35  ;;  %v475_v54 = vmax.f32 %v455_v41, 0.0  ;;  %1369 = vmatpush3.bf16.msra.mxu0 %v1469_v61 }
 0x221   :  { %v1297_v38 = vpop.f32.mrf.mxu1 }
 0x222   :  { %v458_v40 = vadd.f32 %v1297_v38, %v1109_v58  ;;  %1322 = vmatprep.mubr.bf16.mxu0 %v481_v36  ;;  %v473_v45 = vmax.f32 %v447_v39, 0.0 }
 0x223   :  { %v449_v42 = vpop.f32.mrf.mxu1  ;;  %1323 = vmatmul.mubr.bf16.gmra.mxu0 %v482_v37 }
 0x224   :  { %v450_v43 = vadd.f32 %v1109_v58, %v449_v42  ;;  %v476_v44 = vmax.f32 %v458_v40, 0.0  ;;  %v1470_v58 = vld [vmem:[#allocation7 + $0x98] sm:$0xff]  }
 0x225   :  { %1370 = vmatprep.subr.bf16.mxu0 %v1470_v58 }
 0x226   :  { %v474_v53 = vmax.f32 %v450_v43, 0.0  ;;  %v484_v56 = vpack.c.bf16 %v476_v44, %v475_v54  ;;  %1371 = vmatpush3.bf16.msra.mxu0 %v1470_v58 }
 0x227   :  { %1372 = vmatprep.subr.bf16.mxu0 %v1471_v23 }
 0x228   :  { %v483_v55 = vpack.c.bf16 %v474_v53, %v473_v45 }
 0x22a   :  { %1326 = vmatprep.mubr.bf16.mxu0 %v483_v55  ;;  %1373 = vmatpush3.bf16.msra.mxu0 %v1471_v23 }
 0x22b   :  { %1327 = vmatmul.mubr.bf16.gmra.mxu0 %v484_v56  ;;  %1374 = vmatprep.subr.bf16.mxu0 %v1472_v24 }
 0x22e   :  { %1375 = vmatpush3.bf16.msra.mxu0 %v1472_v24 }
 0x22f   :  { %1376 = vmatprep.subr.bf16.mxu0 %v1473_v25 }
 0x232   :  { %1377 = vmatpush3.bf16.msra.mxu0 %v1473_v25 }
 0x2d3   :  { %v1316_v62 = vpop.f32.mrf.mxu0 }
 0x2d5   :  { %v584_v63 = vpop.f32.mrf.mxu0 }
 0x2d7   :  { %v1317_v0 = vpop.f32.mrf.mxu0 }
 0x2d8   :  { %v648_v21 = vpack.c.bf16 %v1317_v0, %v1316_v62 }
 0x2d9   :  { %v587_v1 = vpop.f32.mrf.mxu0 }
 0x2da   :  { %v647_v22 = vpack.c.bf16 %v587_v1, %v584_v63 }
 0x2db   :  { %v1320_v2 = vpop.f32.mrf.mxu0 }
 0x2dd   :  { %v600_v3 = vpop.f32.mrf.mxu0 }
 0x2df   :  { %v1321_v4 = vpop.f32.mrf.mxu0 }
 0x2e0   :  { %v650_v19 = vpack.c.bf16 %v1321_v4, %v1320_v2 }
 0x2e1   :  { %v603_v5 = vpop.f32.mrf.mxu0 }
 0x2e2   :  { %v649_v20 = vpack.c.bf16 %v603_v5, %v600_v3 }
 0x2e3   :  { %v1324_v6 = vpop.f32.mrf.mxu0 }
 0x2e5   :  { %v616_v7 = vpop.f32.mrf.mxu0 }
 0x2e7   :  { %v1325_v8 = vpop.f32.mrf.mxu0 }
 0x2e8   :  { %v652_v17 = vpack.c.bf16 %v1325_v8, %v1324_v6 }
 0x2e9   :  { %v619_v9 = vpop.f32.mrf.mxu0 }
 0x2ea   :  { %v651_v18 = vpack.c.bf16 %v619_v9, %v616_v7 }
 0x2eb   :  { %v1328_v10 = vpop.f32.mrf.mxu0 }
 0x2ed   :  { %v632_v11 = vpop.f32.mrf.mxu0 }
 0x2ef   :  { %v1329_v12 = vpop.f32.mrf.mxu0 }
 0x2f0   :  { %v654_v13 = vpack.c.bf16 %v1329_v12, %v1328_v10 }
 0x2f1   :  { %v635_v14 = vpop.f32.mrf.mxu0 }
 0x2f2   :  { %v653_v15 = vpack.c.bf16 %v635_v14, %v632_v11  ;;  %1330 = vmatprep.subr.bf16.mxu1 %v654_v13 }
 0x2f3   :  { %1331 = vmatpush3.bf16.msra.mxu1 %v654_v13 }
 0x2f4   :  { %1332 = vmatprep.subr.bf16.mxu1 %v653_v15 }
 0x2f7   :  { %1333 = vmatpush3.bf16.msra.mxu1 %v653_v15 }
 0x2f8   :  { %1334 = vmatprep.subr.bf16.mxu1 %v652_v17 }
 0x2fb   :  { %1335 = vmatpush3.bf16.msra.mxu1 %v652_v17 }
 0x2fc   :  { %1336 = vmatprep.subr.bf16.mxu1 %v651_v18 }
 0x2ff   :  { %1337 = vmatpush3.bf16.msra.mxu1 %v651_v18 }
 0x300   :  { %1338 = vmatprep.subr.bf16.mxu1 %v650_v19 }
 0x303   :  { %1339 = vmatpush3.bf16.msra.mxu1 %v650_v19 }
 0x304   :  { %1340 = vmatprep.subr.bf16.mxu1 %v649_v20 }
 0x307   :  { %1341 = vmatpush3.bf16.msra.mxu1 %v649_v20 }
 0x308   :  { %1342 = vmatprep.subr.bf16.mxu1 %v648_v21 }
 0x30b   :  { %1343 = vmatpush3.bf16.msra.mxu1 %v648_v21 }
 0x30c   :  { %1344 = vmatprep.subr.bf16.mxu1 %v647_v22 }
 0x30f   :  { %1345 = vmatpush3.bf16.msra.mxu1 %v647_v22 }
 0x312   :  { %1347 = vmatmul.mubr.bf16.vlgmr.msra.gmra.mxu1 %v1605_v46 }
 0x313   :  { %1350 = vmatprep.mubr.bf16.mxu1 %v1607_v47 }
 0x31a   :  { %1351 = vmatmul.mubr.bf16.gmra.mxu1 %v1611_v48 }
 0x31b   :  { %1354 = vmatprep.mubr.bf16.mxu1 %v1613_v49 }
 0x322   :  { %1355 = vmatmul.mubr.bf16.gmra.mxu1 %v1617_v50 }
 0x323   :  { %1358 = vmatprep.mubr.bf16.mxu1 %v1619_v51 }
 0x32a   :  { %1359 = vmatmul.mubr.bf16.gmra.mxu1 %v1623_v52 }
 0x32b   :  { %1410 = vmatprep.mubr.bf16.mxu1 %v1602_v16 }
 0x3d2   :  { %v1348_v26 = vpop.f32.mrf.mxu1 }
 0x3d3   :  { %v706_v32 = vadd.f32 %v1348_v26, %v1127_v28 }
 0x3d4   :  { %v697_v27 = vpop.f32.mrf.mxu1 }
 0x3d5   :  { %v698_v30 = vadd.f32 %v1127_v28, %v697_v27  ;;  %v762_v38 = vmax.f32 %v706_v32, 0.0 }
 0x3d6   :  { %v1349_v29 = vpop.f32.mrf.mxu1 }
 0x3d7   :  { %v709_v31 = vadd.f32 %v1349_v29, %v1127_v28  ;;  %v760_v36 = vmax.f32 %v698_v30, 0.0 }
 0x3d8   :  { %v700_v16 = vpop.f32.mrf.mxu1 }
 0x3d9   :  { %v701_v33 = vadd.f32 %v1127_v28, %v700_v16  ;;  %v763_v34 = vmax.f32 %v709_v31, 0.0 }
 0x3da   :  { %v1352_v35 = vpop.f32.mrf.mxu1 }
 0x3db   :  { %v761_v37 = vmax.f32 %v701_v33, 0.0  ;;  %v777_v41 = vpack.c.bf16 %v763_v34, %v762_v38  ;;  %v722_v45 = vadd.f32 %v1352_v35, %v1127_v28 }
 0x3dc   :  { %v713_v39 = vpop.f32.mrf.mxu1 }
 0x3dd   :  { %v776_v40 = vpack.c.bf16 %v761_v37, %v760_v36  ;;  %v714_v43 = vadd.f32 %v1127_v28, %v713_v39  ;;  %v766_v60 = vmax.f32 %v722_v45, 0.0 }
 0x3de   :  { %v1353_v42 = vpop.f32.mrf.mxu1 }
 0x3df   :  { %v725_v44 = vadd.f32 %v1353_v42, %v1127_v28  ;;  %1378 = vmatprep.mubr.bf16.mxu0 %v776_v40  ;;  %v764_v57 = vmax.f32 %v714_v43, 0.0 }
 0x3e0   :  { %v716_v53 = vpop.f32.mrf.mxu1  ;;  %1379 = vmatmul.mubr.bf16.vlgmr.msra.gmra.mxu0 %v777_v41 }
 0x3e1   :  { %v717_v54 = vadd.f32 %v1127_v28, %v716_v53  ;;  %v767_v55 = vmax.f32 %v725_v44, 0.0 }
 0x3e2   :  { %v1356_v56 = vpop.f32.mrf.mxu1 }
 0x3e3   :  { %v765_v59 = vmax.f32 %v717_v54, 0.0  ;;  %v779_v62 = vpack.c.bf16 %v767_v55, %v766_v60  ;;  %v738_v2 = vadd.f32 %v1356_v56, %v1127_v28  ;;  %v1137_v56 = vld [vmem:[%s1657_s3 + $0x2] ss:$0 sm:$0xff]  ;;  %s1565_s3 = smov [#allocation8]  }
 0x3e4   :  { %v729_v61 = vpop.f32.mrf.mxu1  ;;  %s1080_s9 = sshll.u32 %s1565_s3, 4  ;;  %s1081_s9 = int_to_ptr.vmem [resolvable:$true] %s1080_s9 }
 0x3e5   :  { %v778_v58 = vpack.c.bf16 %v765_v59, %v764_v57  ;;  %v730_v0 = vadd.f32 %v1127_v28, %v729_v61  ;;  %v770_v9 = vmax.f32 %v738_v2, 0.0  ;;  %s1534_s10 = scalar_lea.vmem %s1081_s9, 2048  ;;  %p1539_p2 = scmp.lt.s32.totalorder %s1081_s9, %s1081_s9 }
 0x3e6   :  { %v1357_v63 = vpop.f32.mrf.mxu1  ;;  %p1535_p1 = scmp.ne.s32.totalorder %s1081_s9, %s1534_s10  ;;  %p1540_p3 = scmp.lt.s32.totalorder %s1534_s10, %s1534_s10 }
 0x3e7   :  { %v741_v1 = vadd.f32 %v1357_v63, %v1127_v28  ;;  %1382 = vmatprep.mubr.bf16.mxu0 %v778_v58  ;;  %v768_v7 = vmax.f32 %v730_v0, 0.0 }
 0x3e8   :  { %v732_v3 = vpop.f32.mrf.mxu1  ;;  %1383 = vmatmul.mubr.bf16.gmra.mxu0 %v779_v62  ;;  %p1541_p4 = por %p1540_p3, %p1539_p2 }
 0x3e9   :  { %v733_v4 = vadd.f32 %v1127_v28, %v732_v3  ;;  %v771_v5 = vmax.f32 %v741_v1, 0.0 }
 0x3ea   :  { %v1360_v6 = vpop.f32.mrf.mxu1  ;;  %p1542_p5 = pnand %p1541_p4, %p1535_p1 }
 0x3eb   :  { %v769_v8 = vmax.f32 %v733_v4, 0.0  ;;  %v781_v12 = vpack.c.bf16 %v771_v5, %v770_v9  ;;  %v754_v17 = vadd.f32 %v1360_v6, %v1127_v28 }
 0x3ec   :  { %v745_v10 = vpop.f32.mrf.mxu1 }
 0x3ed   :  { %v780_v11 = vpack.c.bf16 %v769_v8, %v768_v7  ;;  %v746_v14 = vadd.f32 %v1127_v28, %v745_v10  ;;  %v774_v23 = vmax.f32 %v754_v17, 0.0 }
 0x3ee   :  { %v1361_v13 = vpop.f32.mrf.mxu1 }
 0x3ef   :  { %v757_v15 = vadd.f32 %v1361_v13, %v1127_v28  ;;  %1386 = vmatprep.mubr.bf16.mxu0 %v780_v11  ;;  %v772_v21 = vmax.f32 %v746_v14, 0.0 }
 0x3f0   :  { %v748_v18 = vpop.f32.mrf.mxu1  ;;  %1387 = vmatmul.mubr.bf16.gmra.mxu0 %v781_v12 }
 0x3f1   :  { %v749_v19 = vadd.f32 %v1127_v28, %v748_v18  ;;  %v775_v20 = vmax.f32 %v757_v15, 0.0 }
 0x3f3   :  { %v773_v22 = vmax.f32 %v749_v19, 0.0  ;;  %v783_v25 = vpack.c.bf16 %v775_v20, %v774_v23 }
 0x3f5   :  { %v782_v24 = vpack.c.bf16 %v773_v22, %v772_v21 }
 0x3f7   :  { %1390 = vmatprep.mubr.bf16.mxu0 %v782_v24 }
 0x3f8   :  { %1391 = vmatmul.mubr.bf16.gmra.mxu0 %v783_v25 }
 0x4a0   :  { %v1380_v26 = vpop.f32.mrf.mxu0 }
 0x4a2   :  { %v883_v27 = vpop.f32.mrf.mxu0 }
 0x4a4   :  { %v1381_v29 = vpop.f32.mrf.mxu0 }
 0x4a5   :  { %v947_v54 = vpack.c.bf16 %v1381_v29, %v1380_v26 }
 0x4a6   :  { %v886_v30 = vpop.f32.mrf.mxu0 }
 0x4a7   :  { %v946_v55 = vpack.c.bf16 %v886_v30, %v883_v27 }
 0x4a8   :  { %v1384_v31 = vpop.f32.mrf.mxu0 }
 0x4aa   :  { %v899_v32 = vpop.f32.mrf.mxu0 }
 0x4ac   :  { %v1385_v16 = vpop.f32.mrf.mxu0 }
 0x4ad   :  { %v949_v45 = vpack.c.bf16 %v1385_v16, %v1384_v31 }
 0x4ae   :  { %v902_v33 = vpop.f32.mrf.mxu0 }
 0x4af   :  { %v948_v53 = vpack.c.bf16 %v902_v33, %v899_v32 }
 0x4b0   :  { %v1388_v34 = vpop.f32.mrf.mxu0 }
 0x4b2   :  { %v915_v35 = vpop.f32.mrf.mxu0 }
 0x4b4   :  { %v1389_v36 = vpop.f32.mrf.mxu0 }
 0x4b5   :  { %v951_v43 = vpack.c.bf16 %v1389_v36, %v1388_v34 }
 0x4b6   :  { %v918_v28 = vpop.f32.mrf.mxu0 }
 0x4b7   :  { %v950_v44 = vpack.c.bf16 %v918_v28, %v915_v35 }
 0x4b8   :  { %v1392_v37 = vpop.f32.mrf.mxu0 }
 0x4ba   :  { %v931_v38 = vpop.f32.mrf.mxu0 }
 0x4bc   :  { %v1393_v39 = vpop.f32.mrf.mxu0 }
 0x4bd   :  { %v953_v40 = vpack.c.bf16 %v1393_v39, %v1392_v37 }
 0x4be   :  { %v934_v41 = vpop.f32.mrf.mxu0 }
 0x4bf   :  { %v952_v42 = vpack.c.bf16 %v934_v41, %v931_v38  ;;  %1394 = vmatprep.subr.bf16.mxu1 %v953_v40 }
 0x4c0   :  { %1395 = vmatpush3.bf16.msra.mxu1 %v953_v40 }
 0x4c1   :  { %1396 = vmatprep.subr.bf16.mxu1 %v952_v42 }
 0x4c4   :  { %1397 = vmatpush3.bf16.msra.mxu1 %v952_v42 }
 0x4c5   :  { %1398 = vmatprep.subr.bf16.mxu1 %v951_v43 }
 0x4c8   :  { %1399 = vmatpush3.bf16.msra.mxu1 %v951_v43 }
 0x4c9   :  { %1400 = vmatprep.subr.bf16.mxu1 %v950_v44 }
 0x4cc   :  { %1401 = vmatpush3.bf16.msra.mxu1 %v950_v44 }
 0x4cd   :  { %1402 = vmatprep.subr.bf16.mxu1 %v949_v45 }
 0x4d0   :  { %1403 = vmatpush3.bf16.msra.mxu1 %v949_v45 }
 0x4d1   :  { %1404 = vmatprep.subr.bf16.mxu1 %v948_v53 }
 0x4d4   :  { %1405 = vmatpush3.bf16.msra.mxu1 %v948_v53 }
 0x4d5   :  { %1406 = vmatprep.subr.bf16.mxu1 %v947_v54 }
 0x4d8   :  { %1407 = vmatpush3.bf16.msra.mxu1 %v947_v54 }
 0x4d9   :  { %1408 = vmatprep.subr.bf16.mxu1 %v946_v55 }
 0x4dc   :  { %1409 = vmatpush3.bf16.msra.mxu1 %v946_v55 }
 0x4df   :  { %1411 = vmatmul.mubr.bf16.vlgmr.msra.gmra.mxu1 %v1605_v46 }
 0x4e0   :  { %1414 = vmatprep.mubr.bf16.mxu1 %v1607_v47 }
 0x4e7   :  { %1415 = vmatmul.mubr.bf16.gmra.mxu1 %v1611_v48 }
 0x4e8   :  { %1418 = vmatprep.mubr.bf16.mxu1 %v1613_v49 }
 0x4ef   :  { %1419 = vmatmul.mubr.bf16.gmra.mxu1 %v1617_v50 }
 0x4f0   :  { %1422 = vmatprep.mubr.bf16.mxu1 %v1619_v51 }
 0x4f7   :  { %1423 = vmatmul.mubr.bf16.gmra.mxu1 %v1623_v52 }
 0x59f   :  { %v1412_v57 = vpop.f32.mrf.mxu1 }
 0x5a0   :  { %v1005_v59 = vadd.f32 %v1412_v57, %v1137_v56 }
 0x5a1   :  { %v996_v60 = vpop.f32.mrf.mxu1 }
 0x5a2   :  { %1061 = vst [vmem:[#allocation8 + $0x10] sm:$0xff] %v1005_v59  ;;  %v997_v46 = vadd.f32 %v1137_v56, %v996_v60 }
 0x5a3   :  { %v1413_v47 = vpop.f32.mrf.mxu1 }
 0x5a4   :  { %1059 = vst [vmem:[#allocation8] sm:$0xff] %v997_v46  ;;  %v1008_v48 = vadd.f32 %v1413_v47, %v1137_v56 }
 0x5a5   :  { %v999_v61 = vpop.f32.mrf.mxu1 }
 0x5a6   :  { %1062 = vst [vmem:[#allocation8 + $0x18] sm:$0xff] %v1008_v48  ;;  %v1000_v49 = vadd.f32 %v1137_v56, %v999_v61 }
 0x5a7   :  { %v1416_v50 = vpop.f32.mrf.mxu1 }
 0x5a8   :  { %1060 = vst [vmem:[#allocation8 + $0x8] sm:$0xff] %v1000_v49  ;;  %v1021_v51 = vadd.f32 %v1416_v50, %v1137_v56 }
 0x5a9   :  { %v1012_v58 = vpop.f32.mrf.mxu1 }
 0x5aa   :  { %1065 = vst [vmem:[#allocation8 + $0x30] sm:$0xff] %v1021_v51  ;;  %v1013_v52 = vadd.f32 %v1137_v56, %v1012_v58 }
 0x5ab   :  { %v1417_v62 = vpop.f32.mrf.mxu1 }
 0x5ac   :  { %1063 = vst [vmem:[#allocation8 + $0x20] sm:$0xff] %v1013_v52  ;;  %v1024_v63 = vadd.f32 %v1417_v62, %v1137_v56 }
 0x5ad   :  { %v1015_v0 = vpop.f32.mrf.mxu1 }
 0x5ae   :  { %1066 = vst [vmem:[#allocation8 + $0x38] sm:$0xff] %v1024_v63  ;;  %v1016_v1 = vadd.f32 %v1137_v56, %v1015_v0 }
 0x5af   :  { %v1420_v2 = vpop.f32.mrf.mxu1 }
 0x5b0   :  { %1064 = vst [vmem:[#allocation8 + $0x28] sm:$0xff] %v1016_v1  ;;  %v1037_v3 = vadd.f32 %v1420_v2, %v1137_v56 }
 0x5b1   :  { %v1028_v4 = vpop.f32.mrf.mxu1 }
 0x5b2   :  { %1069 = vst [vmem:[#allocation8 + $0x50] sm:$0xff] %v1037_v3  ;;  %v1029_v5 = vadd.f32 %v1137_v56, %v1028_v4 }
 0x5b3   :  { %v1421_v6 = vpop.f32.mrf.mxu1 }
 0x5b4   :  { %1067 = vst [vmem:[#allocation8 + $0x40] sm:$0xff] %v1029_v5  ;;  %v1040_v7 = vadd.f32 %v1421_v6, %v1137_v56 }
 0x5b5   :  { %v1031_v8 = vpop.f32.mrf.mxu1 }
 0x5b6   :  { %1070 = vst [vmem:[#allocation8 + $0x58] sm:$0xff] %v1040_v7  ;;  %v1032_v9 = vadd.f32 %v1137_v56, %v1031_v8 }
 0x5b7   :  { %v1424_v10 = vpop.f32.mrf.mxu1 }
 0x5b8   :  { %1068 = vst [vmem:[#allocation8 + $0x48] sm:$0xff] %v1032_v9  ;;  %v1053_v11 = vadd.f32 %v1424_v10, %v1137_v56 }
 0x5b9   :  { %v1044_v12 = vpop.f32.mrf.mxu1 }
 0x5ba   :  { %1073 = vst [vmem:[#allocation8 + $0x70] sm:$0xff] %v1053_v11  ;;  %v1045_v13 = vadd.f32 %v1137_v56, %v1044_v12 }
 0x5bb   :  { %v1425_v14 = vpop.f32.mrf.mxu1 }
 0x5bc   :  { %1071 = vst [vmem:[#allocation8 + $0x60] sm:$0xff] %v1045_v13  ;;  %v1056_v15 = vadd.f32 %v1425_v14, %v1137_v56 }
 0x5bd   :  { %v1047_v17 = vpop.f32.mrf.mxu1 }
 0x5be   :  { %1074 = vst [vmem:[#allocation8 + $0x78] sm:$0xff] %v1056_v15  ;;  %v1048_v18 = vadd.f32 %v1137_v56, %v1047_v17 }
 0x5c0   :  { %1072 = vst [vmem:[#allocation8 + $0x68] sm:$0xff] %v1048_v18 }
 0x5c1   :  { %1545 = shalt.err (!%p1542_p5)
}
 0x5c2   :  { %s1566_s11 = smov 128   ;;  %s1567_s12 = smov 8  }
 0x5c3   :  { %1086 = dma.vmem_to_hbm [thread:$0]  %s1081_s9, 2048, %s1658_s4, [#allocation4], %s1566_s11, %s1566_s11, %s1567_s12  }
 0x5c4   :  { %1558 = dma.done.wait [#allocation4], 2048  }
 0x5c5   :  { %1559 = vsyncadd [#allocation4], 4294965248 }
 0x5c6   :  { %1090 = vsyncpa [#allocation3], 1 }
 0x5c7   :  { %1091 = vsyncpa [#allocation6], 1 }
 0x5c8   :  { %1092 = vsyncpa [#allocation4], 1 }

</bundles_post_ra>
